<compile_context>
chip_gen: v7x
topology: tpu7x:2x2x1
jax: 0.10.0
libtpu: 0.0.40
codegen_flags: <defaults>
</compile_context>

<pallas_src>
import numpy as np
import jax
import jax.numpy as jnp
from jax.experimental import pallas as pl
from jax.experimental.pallas import tpu as pltpu


def _round_up(n, m):
    return -(-n // m) * m


# -----------------------------------------------------------------------------
# Static packing layout: name -> (row_offset, n_rows, n_cols)
# -----------------------------------------------------------------------------
def build_layout(input_dim=4, latent_dim=2, hidden_dim=32):
    feat = input_dim - 2
    h, h2 = hidden_dim, hidden_dim * 2
    weights = [
        ("enc1_w", feat, h), ("enc2_w", h, h2), ("enc3_w", h2, h),
        ("muvar_w", h, 2 * latent_dim),
        ("dec1_w", latent_dim, h), ("dec2_w", h, h2), ("dec3_w", h2, h),
        ("dec4_w", h, feat),
        ("sdf1_w", latent_dim + 2, h), ("sdf2_w", h, h2), ("sdf3_w", h2, h),
        ("sdf4_w", h, 1),
    ]
    vectors = [  # all one-row gamma/beta/bias vectors, packed densely
        ("enc1_g", h), ("enc1_b", h), ("enc2_g", h2), ("enc2_b", h2),
        ("enc3_g", h), ("enc3_b", h),
        ("muvar_b", 2 * latent_dim),
        ("dec1_g", h), ("dec1_b", h), ("dec2_g", h2), ("dec2_b", h2),
        ("dec3_g", h), ("dec3_b", h), ("dec4_b", feat),
        ("sdf1_g", h), ("sdf1_b", h), ("sdf2_g", h2), ("sdf2_b", h2),
        ("sdf3_g", h), ("sdf3_b", h), ("sdf4_b", 1),
    ]
    layout, off = {}, 0
    for name, nin, nout in weights:
        layout[name] = (off, nin, nout)
        off += _round_up(nin, 8)          # 8-aligned MXU operand tiles
    for name, nout in vectors:
        layout[name] = (off, 1, nout)
        off += 1                          # dense: one row per vector
    rows = _round_up(off, 8)
    lanes = max(max(n for *_, n in weights), max(n for _, n in vectors))
    return layout, rows, lanes            # lanes = 64 for hidden_dim=32


# -----------------------------------------------------------------------------
# Parameter construction (mirrors AE.__init__ / init_weights) + packing
# -----------------------------------------------------------------------------
def init_params(key, input_dim=4, latent_dim=2, hidden_dim=32):
    feat = input_dim - 2
    h, h2 = hidden_dim, hidden_dim * 2

    def xavier(k, fi, fo):
        bound = float(np.sqrt(6.0 / (fi + fo)))
        return jax.random.uniform(k, (fi, fo), jnp.float32, -bound, bound)

    keys = iter(jax.random.split(key, 32))
    p = {}

    def bn(prefix, n):
        p[prefix + "_g"] = jnp.ones((1, n), jnp.float32)   # gamma
        p[prefix + "_b"] = jnp.zeros((1, n), jnp.float32)  # beta

    # encoder  (Linear biases are zero-init AND cancel in training-mode BN)
    p["enc1_w"] = xavier(next(keys), feat, h); bn("enc1", h)
    p["enc2_w"] = xavier(next(keys), h, h2);   bn("enc2", h2)
    p["enc3_w"] = xavier(next(keys), h2, h);   bn("enc3", h)
    # fc_mu | fc_var fused into one weight (lane-concat offline)
    w_mu = xavier(next(keys), h, latent_dim)
    w_var = xavier(next(keys), h, latent_dim)
    p["muvar_w"] = jnp.concatenate([w_mu, w_var], axis=1)
    p["muvar_b"] = jnp.zeros((1, 2 * latent_dim), jnp.float32)
    # decoder_input
    p["dec1_w"] = xavier(next(keys), latent_dim, h); bn("dec1", h)
    p["dec2_w"] = xavier(next(keys), h, h2);         bn("dec2", h2)
    p["dec3_w"] = xavier(next(keys), h2, h);         bn("dec3", h)
    p["dec4_w"] = xavier(next(keys), h, feat)
    p["dec4_b"] = jnp.zeros((1, feat), jnp.float32)
    # decoder_sdf
    p["sdf1_w"] = xavier(next(keys), latent_dim + 2, h); bn("sdf1", h)
    p["sdf2_w"] = xavier(next(keys), h, h2);             bn("sdf2", h2)
    p["sdf3_w"] = xavier(next(keys), h2, h);             bn("sdf3", h)
    p["sdf4_w"] = xavier(next(keys), h, 1)
    p["sdf4_b"] = jnp.zeros((1, 1), jnp.float32)
    return p


def pack_params(params, layout, rows, lanes):
    slab = np.zeros((rows, lanes), np.float32)
    for name, arr in params.items():
        off, nin, nout = layout[name]
        slab[off:off + nin, :nout] = np.asarray(arr, np.float32).reshape(nin, nout)
    return jnp.asarray(slab)


# -----------------------------------------------------------------------------
# Kernel
# -----------------------------------------------------------------------------
def make_ae_kernel(layout, *, input_dim, latent_dim, slope=0.2, bn_eps=1e-5):
    feat = input_dim - 2

    def kernel(xin_ref, p_ref, out_ref):
        # --- static-slice accessors into the packed parameter slab -----------
        def wmat(name):
            off, nin, nout = layout[name]
            return p_ref[off:off + nin, 0:nout]

        def wrow(name):
            off, _, nout = layout[name]
            return p_ref[off:off + 1, 0:nout]

        def mm(h, w):
            # K<=4 dots stay on the VPU (broadcast mul-add) to skip the MXU
            # push/drain round-trip; K=32/64 dots use the MXU.
            k = h.shape[1]
            if k <= 4:
                acc = h[:, 0:1] * w[0:1, :]
                for i in range(1, k):
                    acc = acc + h[:, i:i + 1] * w[i:i + 1, :]
                return acc
            return jnp.dot(h, w, preferred_element_type=jnp.float32)

        def bn_lrelu(h, prefix):
            # Training-mode BatchNorm1d: centered (biased) variance, exactly
            # as PyTorch computes it -> no E[h^2]-mean^2 cancellation.
            inv_n = 1.0 / h.shape[0]
            mean = jnp.sum(h, axis=0, keepdims=True) * inv_n
            diff = h - mean
            var = jnp.sum(diff * diff, axis=0, keepdims=True) * inv_n
            scale = wrow(prefix + "_g") * jax.lax.rsqrt(var + bn_eps)
            y = diff * scale + wrow(prefix + "_b")
            return jnp.maximum(y, slope * y)            # LeakyReLU(0.2)

        xin = xin_ref[...]                              # [x | eps] lane-packed
        qp = xin[:, 0:2]                                # query points
        h = xin[:, 2:2 + feat]                          # encoder features
        eps = xin[:, input_dim:input_dim + latent_dim]  # reparam noise

        # ---- encoder:  3 x (Linear[no bias] -> BN -> LeakyReLU) ----
        h = bn_lrelu(mm(h, wmat("enc1_w")), "enc1")
        h = bn_lrelu(mm(h, wmat("enc2_w")), "enc2")
        h = bn_lrelu(mm(h, wmat("enc3_w")), "enc3")

        # ---- fused fc_mu | fc_var head + reparameterize ----
        y = mm(h, wmat("muvar_w")) + wrow("muvar_b")
        mu = y[:, 0:latent_dim]
        log_var = y[:, latent_dim:2 * latent_dim]
        z = mu + eps * jnp.exp(0.5 * log_var)

        # ---- decoder_input ----
        d = bn_lrelu(mm(z, wmat("dec1_w")), "dec1")
        d = bn_lrelu(mm(d, wmat("dec2_w")), "dec2")
        d = bn_lrelu(mm(d, wmat("dec3_w")), "dec3")
        x_recon = mm(d, wmat("dec4_w")) + wrow("dec4_b")

        # ---- decoder_sdf ----
        # concat([z, qp]) @ W1  ==  z @ W1[:L] + qp @ W1[L:]   (no lane concat)
        w1 = wmat("sdf1_w")                             # (latent_dim + 2, hidden)
        s = bn_lrelu(mm(z, w1[0:latent_dim, :]) +
                     mm(qp, w1[latent_dim:latent_dim + 2, :]), "sdf1")
        s = bn_lrelu(mm(s, wmat("sdf2_w")), "sdf2")
        s = bn_lrelu(mm(s, wmat("sdf3_w")), "sdf3")
        sdf = mm(s, wmat("sdf4_w")) + wrow("sdf4_b")

        # ---- single full-ref store: [x_recon | sdf | z | pad] ----
        parts = [x_recon, sdf, z]
        pad_w = out_ref.shape[1] - (feat + 1 + latent_dim)
        if pad_w > 0:
            parts.append(jnp.zeros((x_recon.shape[0], pad_w), jnp.float32))
        out_ref[...] = jnp.concatenate(parts, axis=1)

    return kernel


# -----------------------------------------------------------------------------
# Wrapper
# -----------------------------------------------------------------------------
def make_ae_forward(layout, *, batch, input_dim, latent_dim):
    feat = input_dim - 2
    out_w = _round_up(feat + 1 + latent_dim, 8)
    kernel = make_ae_kernel(layout, input_dim=input_dim, latent_dim=latent_dim)

    vmem = pl.BlockSpec(memory_space=pltpu.MemorySpace.VMEM)
    call = pl.pallas_call(
        kernel,
        out_shape=jax.ShapeDtypeStruct((batch, out_w), jnp.float32),
        in_specs=[vmem, vmem],           # [x|eps] packed input, param slab
        out_specs=vmem,                  # one packed output -> one writeback DMA
    )

    @jax.jit
    def forward(x, noise, param_slab):
        packed_in = jnp.concatenate([x, noise], axis=1)   # (B, input+latent)
        packed = call(packed_in, param_slab)
        x_recon = packed[:, 0:feat]
        sdf_pred = packed[:, feat:feat + 1]
        z = packed[:, feat + 1:feat + 1 + latent_dim]
        return x_recon, sdf_pred, z

    return forward


# -----------------------------------------------------------------------------
# Main
# -----------------------------------------------------------------------------
if __name__ == "__main__":
    B, INPUT_DIM, LATENT_DIM, HIDDEN_DIM = 8, 4, 2, 32

    root = jax.random.PRNGKey(0)
    k_x, k_eps, k_params = jax.random.split(root, 3)

    x = jax.random.normal(k_x, (B, INPUT_DIM), jnp.float32)
    # reparameterization noise (torch.randn_like(std)) supplied explicitly
    eps = jax.random.normal(k_eps, (B, LATENT_DIM), jnp.float32)

    layout, rows, lanes = build_layout(INPUT_DIM, LATENT_DIM, HIDDEN_DIM)
    params = init_params(k_params, INPUT_DIM, LATENT_DIM, HIDDEN_DIM)
    slab = pack_params(params, layout, rows, lanes)

    forward = make_ae_forward(layout, batch=B, input_dim=INPUT_DIM,
                              latent_dim=LATENT_DIM)

    x_recon, sdf_pred, z = forward(x, eps, slab)
    jax.block_until_ready((x_recon, sdf_pred, z))

    assert x_recon.shape == (B, INPUT_DIM - 2)
    assert sdf_pred.shape == (B, 1)
    assert z.shape == (B, LATENT_DIM)
    assert all(bool(jnp.all(jnp.isfinite(a))) for a in (x_recon, sdf_pred, z))

    print("KERNEL_OK")
</pallas_src>

<mosaic_0001>
module attributes {stable_mosaic.version = 11 : i64} {
  func.func @kernel(%arg0: memref<8x6xf32, #tpu.memory_space<vmem>>, %arg1: memref<432x64xf32, #tpu.memory_space<vmem>>, %arg2: memref<8x8xf32, #tpu.memory_space<vmem>>) attributes {dimension_semantics = [], scalar_prefetch = 0 : i64, scratch_operands = 0 : i64, tpu.core_type = #tpu.core_type<tc>} {
    %c0 = arith.constant 0 : index
    %c0_0 = arith.constant 0 : index
    %0 = vector.load %arg0[%c0, %c0_0] : memref<8x6xf32, #tpu.memory_space<vmem>>, vector<8x6xf32>
    %1 = vector.extract_strided_slice %0 {offsets = [0, 0], sizes = [8, 2], strides = [1, 1]} : vector<8x6xf32> to vector<8x2xf32>
    %2 = vector.extract_strided_slice %0 {offsets = [0, 2], sizes = [8, 2], strides = [1, 1]} : vector<8x6xf32> to vector<8x2xf32>
    %3 = vector.extract_strided_slice %0 {offsets = [0, 4], sizes = [8, 2], strides = [1, 1]} : vector<8x6xf32> to vector<8x2xf32>
    %c0_1 = arith.constant 0 : index
    %c0_2 = arith.constant 0 : index
    %4 = vector.load %arg1[%c0_1, %c0_2] : memref<432x64xf32, #tpu.memory_space<vmem>>, vector<2x32xf32>
    %5 = vector.extract_strided_slice %2 {offsets = [0, 0], sizes = [8, 1], strides = [1, 1]} : vector<8x2xf32> to vector<8x1xf32>
    %6 = vector.extract_strided_slice %4 {offsets = [0, 0], sizes = [1, 32], strides = [1, 1]} : vector<2x32xf32> to vector<1x32xf32>
    %7 = vector.broadcast %5 : vector<8x1xf32> to vector<8x32xf32>
    %8 = vector.broadcast %6 : vector<1x32xf32> to vector<8x32xf32>
    %9 = arith.mulf %7, %8 : vector<8x32xf32>
    %10 = vector.extract_strided_slice %2 {offsets = [0, 1], sizes = [8, 1], strides = [1, 1]} : vector<8x2xf32> to vector<8x1xf32>
    %11 = vector.extract_strided_slice %4 {offsets = [1, 0], sizes = [1, 32], strides = [1, 1]} : vector<2x32xf32> to vector<1x32xf32>
    %12 = vector.broadcast %10 : vector<8x1xf32> to vector<8x32xf32>
    %13 = vector.broadcast %11 : vector<1x32xf32> to vector<8x32xf32>
    %14 = arith.mulf %12, %13 : vector<8x32xf32>
    %15 = arith.addf %9, %14 : vector<8x32xf32>
    %cst = arith.constant dense<0.000000e+00> : vector<32xf32>
    %16 = vector.multi_reduction <add>, %15, %cst [0] : vector<8x32xf32> to vector<32xf32>
    %17 = vector.shape_cast %16 : vector<32xf32> to vector<1x32xf32>
    %cst_3 = arith.constant 1.250000e-01 : f32
    %18 = vector.broadcast %cst_3 : f32 to vector<1x32xf32>
    %19 = arith.mulf %17, %18 : vector<1x32xf32>
    %20 = vector.broadcast %19 : vector<1x32xf32> to vector<8x32xf32>
    %21 = arith.subf %15, %20 : vector<8x32xf32>
    %22 = arith.mulf %21, %21 : vector<8x32xf32>
    %cst_4 = arith.constant dense<0.000000e+00> : vector<32xf32>
    %23 = vector.multi_reduction <add>, %22, %cst_4 [0] : vector<8x32xf32> to vector<32xf32>
    %24 = vector.shape_cast %23 : vector<32xf32> to vector<1x32xf32>
    %cst_5 = arith.constant 1.250000e-01 : f32
    %25 = vector.broadcast %cst_5 : f32 to vector<1x32xf32>
    %26 = arith.mulf %24, %25 : vector<1x32xf32>
    %c408 = arith.constant 408 : index
    %c0_6 = arith.constant 0 : index
    %27 = vector.load %arg1[%c408, %c0_6] : memref<432x64xf32, #tpu.memory_space<vmem>>, vector<1x32xf32>
    %cst_7 = arith.constant 9.99999974E-6 : f32
    %28 = vector.broadcast %cst_7 : f32 to vector<1x32xf32>
    %29 = arith.addf %26, %28 : vector<1x32xf32>
    %30 = math.rsqrt %29 : vector<1x32xf32>
    %31 = arith.mulf %27, %30 : vector<1x32xf32>
    %32 = vector.broadcast %31 : vector<1x32xf32> to vector<8x32xf32>
    %33 = arith.mulf %21, %32 : vector<8x32xf32>
    %c409 = arith.constant 409 : index
    %c0_8 = arith.constant 0 : index
    %34 = vector.load %arg1[%c409, %c0_8] : memref<432x64xf32, #tpu.memory_space<vmem>>, vector<1x32xf32>
    %35 = vector.broadcast %34 : vector<1x32xf32> to vector<8x32xf32>
    %36 = arith.addf %33, %35 : vector<8x32xf32>
    %cst_9 = arith.constant 2.000000e-01 : f32
    %37 = vector.broadcast %cst_9 : f32 to vector<8x32xf32>
    %38 = arith.mulf %37, %36 : vector<8x32xf32>
    %39 = arith.maximumf %36, %38 : vector<8x32xf32>
    %c8 = arith.constant 8 : index
    %c0_10 = arith.constant 0 : index
    %40 = vector.load %arg1[%c8, %c0_10] : memref<432x64xf32, #tpu.memory_space<vmem>>, vector<32x64xf32>
    %cst_11 = arith.constant dense<0.000000e+00> : vector<8x64xf32>
    %41 = tpu.matmul %39, %40, %cst_11 {dimension_numbers = #tpu.dot_dimension_numbers<[1], [0], [0], [1], [0, 0, 1, 1], [], []>} : vector<8x32xf32>, vector<32x64xf32>, vector<8x64xf32> -> vector<8x64xf32>
    %cst_12 = arith.constant dense<0.000000e+00> : vector<64xf32>
    %42 = vector.multi_reduction <add>, %41, %cst_12 [0] : vector<8x64xf32> to vector<64xf32>
    %43 = vector.shape_cast %42 : vector<64xf32> to vector<1x64xf32>
    %cst_13 = arith.constant 1.250000e-01 : f32
    %44 = vector.broadcast %cst_13 : f32 to vector<1x64xf32>
    %45 = arith.mulf %43, %44 : vector<1x64xf32>
    %46 = vector.broadcast %45 : vector<1x64xf32> to vector<8x64xf32>
    %47 = arith.subf %41, %46 : vector<8x64xf32>
    %48 = arith.mulf %47, %47 : vector<8x64xf32>
    %cst_14 = arith.constant dense<0.000000e+00> : vector<64xf32>
    %49 = vector.multi_reduction <add>, %48, %cst_14 [0] : vector<8x64xf32> to vector<64xf32>
    %50 = vector.shape_cast %49 : vector<64xf32> to vector<1x64xf32>
    %cst_15 = arith.constant 1.250000e-01 : f32
    %51 = vector.broadcast %cst_15 : f32 to vector<1x64xf32>
    %52 = arith.mulf %50, %51 : vector<1x64xf32>
    %c410 = arith.constant 410 : index
    %c0_16 = arith.constant 0 : index
    %53 = vector.load %arg1[%c410, %c0_16] : memref<432x64xf32, #tpu.memory_space<vmem>>, vector<1x64xf32>
    %cst_17 = arith.constant 9.99999974E-6 : f32
    %54 = vector.broadcast %cst_17 : f32 to vector<1x64xf32>
    %55 = arith.addf %52, %54 : vector<1x64xf32>
    %56 = math.rsqrt %55 : vector<1x64xf32>
    %57 = arith.mulf %53, %56 : vector<1x64xf32>
    %58 = vector.broadcast %57 : vector<1x64xf32> to vector<8x64xf32>
    %59 = arith.mulf %47, %58 : vector<8x64xf32>
    %c411 = arith.constant 411 : index
    %c0_18 = arith.constant 0 : index
    %60 = vector.load %arg1[%c411, %c0_18] : memref<432x64xf32, #tpu.memory_space<vmem>>, vector<1x64xf32>
    %61 = vector.broadcast %60 : vector<1x64xf32> to vector<8x64xf32>
    %62 = arith.addf %59, %61 : vector<8x64xf32>
    %cst_19 = arith.constant 2.000000e-01 : f32
    %63 = vector.broadcast %cst_19 : f32 to vector<8x64xf32>
    %64 = arith.mulf %63, %62 : vector<8x64xf32>
    %65 = arith.maximumf %62, %64 : vector<8x64xf32>
    %c40 = arith.constant 40 : index
    %c0_20 = arith.constant 0 : index
    %66 = vector.load %arg1[%c40, %c0_20] : memref<432x64xf32, #tpu.memory_space<vmem>>, vector<64x32xf32>
    %cst_21 = arith.constant dense<0.000000e+00> : vector<8x32xf32>
    %67 = tpu.matmul %65, %66, %cst_21 {dimension_numbers = #tpu.dot_dimension_numbers<[1], [0], [0], [1], [0, 0, 1, 1], [], []>} : vector<8x64xf32>, vector<64x32xf32>, vector<8x32xf32> -> vector<8x32xf32>
    %cst_22 = arith.constant dense<0.000000e+00> : vector<32xf32>
    %68 = vector.multi_reduction <add>, %67, %cst_22 [0] : vector<8x32xf32> to vector<32xf32>
    %69 = vector.shape_cast %68 : vector<32xf32> to vector<1x32xf32>
    %cst_23 = arith.constant 1.250000e-01 : f32
    %70 = vector.broadcast %cst_23 : f32 to vector<1x32xf32>
    %71 = arith.mulf %69, %70 : vector<1x32xf32>
    %72 = vector.broadcast %71 : vector<1x32xf32> to vector<8x32xf32>
    %73 = arith.subf %67, %72 : vector<8x32xf32>
    %74 = arith.mulf %73, %73 : vector<8x32xf32>
    %cst_24 = arith.constant dense<0.000000e+00> : vector<32xf32>
    %75 = vector.multi_reduction <add>, %74, %cst_24 [0] : vector<8x32xf32> to vector<32xf32>
    %76 = vector.shape_cast %75 : vector<32xf32> to vector<1x32xf32>
    %cst_25 = arith.constant 1.250000e-01 : f32
    %77 = vector.broadcast %cst_25 : f32 to vector<1x32xf32>
    %78 = arith.mulf %76, %77 : vector<1x32xf32>
    %c412 = arith.constant 412 : index
    %c0_26 = arith.constant 0 : index
    %79 = vector.load %arg1[%c412, %c0_26] : memref<432x64xf32, #tpu.memory_space<vmem>>, vector<1x32xf32>
    %cst_27 = arith.constant 9.99999974E-6 : f32
    %80 = vector.broadcast %cst_27 : f32 to vector<1x32xf32>
    %81 = arith.addf %78, %80 : vector<1x32xf32>
    %82 = math.rsqrt %81 : vector<1x32xf32>
    %83 = arith.mulf %79, %82 : vector<1x32xf32>
    %84 = vector.broadcast %83 : vector<1x32xf32> to vector<8x32xf32>
    %85 = arith.mulf %73, %84 : vector<8x32xf32>
    %c413 = arith.constant 413 : index
    %c0_28 = arith.constant 0 : index
    %86 = vector.load %arg1[%c413, %c0_28] : memref<432x64xf32, #tpu.memory_space<vmem>>, vector<1x32xf32>
    %87 = vector.broadcast %86 : vector<1x32xf32> to vector<8x32xf32>
    %88 = arith.addf %85, %87 : vector<8x32xf32>
    %cst_29 = arith.constant 2.000000e-01 : f32
    %89 = vector.broadcast %cst_29 : f32 to vector<8x32xf32>
    %90 = arith.mulf %89, %88 : vector<8x32xf32>
    %91 = arith.maximumf %88, %90 : vector<8x32xf32>
    %c104 = arith.constant 104 : index
    %c0_30 = arith.constant 0 : index
    %92 = vector.load %arg1[%c104, %c0_30] : memref<432x64xf32, #tpu.memory_space<vmem>>, vector<32x4xf32>
    %cst_31 = arith.constant dense<0.000000e+00> : vector<8x4xf32>
    %93 = tpu.matmul %91, %92, %cst_31 {dimension_numbers = #tpu.dot_dimension_numbers<[1], [0], [0], [1], [0, 0, 1, 1], [], []>} : vector<8x32xf32>, vector<32x4xf32>, vector<8x4xf32> -> vector<8x4xf32>
    %c414 = arith.constant 414 : index
    %c0_32 = arith.constant 0 : index
    %94 = vector.load %arg1[%c414, %c0_32] : memref<432x64xf32, #tpu.memory_space<vmem>>, vector<1x4xf32>
    %95 = vector.broadcast %94 : vector<1x4xf32> to vector<8x4xf32>
    %96 = arith.addf %93, %95 : vector<8x4xf32>
    %97 = vector.extract_strided_slice %96 {offsets = [0, 0], sizes = [8, 2], strides = [1, 1]} : vector<8x4xf32> to vector<8x2xf32>
    %98 = vector.extract_strided_slice %96 {offsets = [0, 2], sizes = [8, 2], strides = [1, 1]} : vector<8x4xf32> to vector<8x2xf32>
    %cst_33 = arith.constant 5.000000e-01 : f32
    %99 = vector.broadcast %cst_33 : f32 to vector<8x2xf32>
    %100 = arith.mulf %99, %98 : vector<8x2xf32>
    %101 = math.exp %100 : vector<8x2xf32>
    %102 = arith.mulf %3, %101 : vector<8x2xf32>
    %103 = arith.addf %97, %102 : vector<8x2xf32>
    %c136 = arith.constant 136 : index
    %c0_34 = arith.constant 0 : index
    %104 = vector.load %arg1[%c136, %c0_34] : memref<432x64xf32, #tpu.memory_space<vmem>>, vector<2x32xf32>
    %105 = vector.extract_strided_slice %103 {offsets = [0, 0], sizes = [8, 1], strides = [1, 1]} : vector<8x2xf32> to vector<8x1xf32>
    %106 = vector.extract_strided_slice %104 {offsets = [0, 0], sizes = [1, 32], strides = [1, 1]} : vector<2x32xf32> to vector<1x32xf32>
    %107 = vector.broadcast %105 : vector<8x1xf32> to vector<8x32xf32>
    %108 = vector.broadcast %106 : vector<1x32xf32> to vector<8x32xf32>
    %109 = arith.mulf %107, %108 : vector<8x32xf32>
    %110 = vector.extract_strided_slice %103 {offsets = [0, 1], sizes = [8, 1], strides = [1, 1]} : vector<8x2xf32> to vector<8x1xf32>
    %111 = vector.extract_strided_slice %104 {offsets = [1, 0], sizes = [1, 32], strides = [1, 1]} : vector<2x32xf32> to vector<1x32xf32>
    %112 = vector.broadcast %110 : vector<8x1xf32> to vector<8x32xf32>
    %113 = vector.broadcast %111 : vector<1x32xf32> to vector<8x32xf32>
    %114 = arith.mulf %112, %113 : vector<8x32xf32>
    %115 = arith.addf %109, %114 : vector<8x32xf32>
    %cst_35 = arith.constant dense<0.000000e+00> : vector<32xf32>
    %116 = vector.multi_reduction <add>, %115, %cst_35 [0] : vector<8x32xf32> to vector<32xf32>
    %117 = vector.shape_cast %116 : vector<32xf32> to vector<1x32xf32>
    %cst_36 = arith.constant 1.250000e-01 : f32
    %118 = vector.broadcast %cst_36 : f32 to vector<1x32xf32>
    %119 = arith.mulf %117, %118 : vector<1x32xf32>
    %120 = vector.broadcast %119 : vector<1x32xf32> to vector<8x32xf32>
    %121 = arith.subf %115, %120 : vector<8x32xf32>
    %122 = arith.mulf %121, %121 : vector<8x32xf32>
    %cst_37 = arith.constant dense<0.000000e+00> : vector<32xf32>
    %123 = vector.multi_reduction <add>, %122, %cst_37 [0] : vector<8x32xf32> to vector<32xf32>
    %124 = vector.shape_cast %123 : vector<32xf32> to vector<1x32xf32>
    %cst_38 = arith.constant 1.250000e-01 : f32
    %125 = vector.broadcast %cst_38 : f32 to vector<1x32xf32>
    %126 = arith.mulf %124, %125 : vector<1x32xf32>
    %c415 = arith.constant 415 : index
    %c0_39 = arith.constant 0 : index
    %127 = vector.load %arg1[%c415, %c0_39] : memref<432x64xf32, #tpu.memory_space<vmem>>, vector<1x32xf32>
    %cst_40 = arith.constant 9.99999974E-6 : f32
    %128 = vector.broadcast %cst_40 : f32 to vector<1x32xf32>
    %129 = arith.addf %126, %128 : vector<1x32xf32>
    %130 = math.rsqrt %129 : vector<1x32xf32>
    %131 = arith.mulf %127, %130 : vector<1x32xf32>
    %132 = vector.broadcast %131 : vector<1x32xf32> to vector<8x32xf32>
    %133 = arith.mulf %121, %132 : vector<8x32xf32>
    %c416 = arith.constant 416 : index
    %c0_41 = arith.constant 0 : index
    %134 = vector.load %arg1[%c416, %c0_41] : memref<432x64xf32, #tpu.memory_space<vmem>>, vector<1x32xf32>
    %135 = vector.broadcast %134 : vector<1x32xf32> to vector<8x32xf32>
    %136 = arith.addf %133, %135 : vector<8x32xf32>
    %cst_42 = arith.constant 2.000000e-01 : f32
    %137 = vector.broadcast %cst_42 : f32 to vector<8x32xf32>
    %138 = arith.mulf %137, %136 : vector<8x32xf32>
    %139 = arith.maximumf %136, %138 : vector<8x32xf32>
    %c144 = arith.constant 144 : index
    %c0_43 = arith.constant 0 : index
    %140 = vector.load %arg1[%c144, %c0_43] : memref<432x64xf32, #tpu.memory_space<vmem>>, vector<32x64xf32>
    %cst_44 = arith.constant dense<0.000000e+00> : vector<8x64xf32>
    %141 = tpu.matmul %139, %140, %cst_44 {dimension_numbers = #tpu.dot_dimension_numbers<[1], [0], [0], [1], [0, 0, 1, 1], [], []>} : vector<8x32xf32>, vector<32x64xf32>, vector<8x64xf32> -> vector<8x64xf32>
    %cst_45 = arith.constant dense<0.000000e+00> : vector<64xf32>
    %142 = vector.multi_reduction <add>, %141, %cst_45 [0] : vector<8x64xf32> to vector<64xf32>
    %143 = vector.shape_cast %142 : vector<64xf32> to vector<1x64xf32>
    %cst_46 = arith.constant 1.250000e-01 : f32
    %144 = vector.broadcast %cst_46 : f32 to vector<1x64xf32>
    %145 = arith.mulf %143, %144 : vector<1x64xf32>
    %146 = vector.broadcast %145 : vector<1x64xf32> to vector<8x64xf32>
    %147 = arith.subf %141, %146 : vector<8x64xf32>
    %148 = arith.mulf %147, %147 : vector<8x64xf32>
    %cst_47 = arith.constant dense<0.000000e+00> : vector<64xf32>
    %149 = vector.multi_reduction <add>, %148, %cst_47 [0] : vector<8x64xf32> to vector<64xf32>
    %150 = vector.shape_cast %149 : vector<64xf32> to vector<1x64xf32>
    %cst_48 = arith.constant 1.250000e-01 : f32
    %151 = vector.broadcast %cst_48 : f32 to vector<1x64xf32>
    %152 = arith.mulf %150, %151 : vector<1x64xf32>
    %c417 = arith.constant 417 : index
    %c0_49 = arith.constant 0 : index
    %153 = vector.load %arg1[%c417, %c0_49] : memref<432x64xf32, #tpu.memory_space<vmem>>, vector<1x64xf32>
    %cst_50 = arith.constant 9.99999974E-6 : f32
    %154 = vector.broadcast %cst_50 : f32 to vector<1x64xf32>
    %155 = arith.addf %152, %154 : vector<1x64xf32>
    %156 = math.rsqrt %155 : vector<1x64xf32>
    %157 = arith.mulf %153, %156 : vector<1x64xf32>
    %158 = vector.broadcast %157 : vector<1x64xf32> to vector<8x64xf32>
    %159 = arith.mulf %147, %158 : vector<8x64xf32>
    %c418 = arith.constant 418 : index
    %c0_51 = arith.constant 0 : index
    %160 = vector.load %arg1[%c418, %c0_51] : memref<432x64xf32, #tpu.memory_space<vmem>>, vector<1x64xf32>
    %161 = vector.broadcast %160 : vector<1x64xf32> to vector<8x64xf32>
    %162 = arith.addf %159, %161 : vector<8x64xf32>
    %cst_52 = arith.constant 2.000000e-01 : f32
    %163 = vector.broadcast %cst_52 : f32 to vector<8x64xf32>
    %164 = arith.mulf %163, %162 : vector<8x64xf32>
    %165 = arith.maximumf %162, %164 : vector<8x64xf32>
    %c176 = arith.constant 176 : index
    %c0_53 = arith.constant 0 : index
    %166 = vector.load %arg1[%c176, %c0_53] : memref<432x64xf32, #tpu.memory_space<vmem>>, vector<64x32xf32>
    %cst_54 = arith.constant dense<0.000000e+00> : vector<8x32xf32>
    %167 = tpu.matmul %165, %166, %cst_54 {dimension_numbers = #tpu.dot_dimension_numbers<[1], [0], [0], [1], [0, 0, 1, 1], [], []>} : vector<8x64xf32>, vector<64x32xf32>, vector<8x32xf32> -> vector<8x32xf32>
    %cst_55 = arith.constant dense<0.000000e+00> : vector<32xf32>
    %168 = vector.multi_reduction <add>, %167, %cst_55 [0] : vector<8x32xf32> to vector<32xf32>
    %169 = vector.shape_cast %168 : vector<32xf32> to vector<1x32xf32>
    %cst_56 = arith.constant 1.250000e-01 : f32
    %170 = vector.broadcast %cst_56 : f32 to vector<1x32xf32>
    %171 = arith.mulf %169, %170 : vector<1x32xf32>
    %172 = vector.broadcast %171 : vector<1x32xf32> to vector<8x32xf32>
    %173 = arith.subf %167, %172 : vector<8x32xf32>
    %174 = arith.mulf %173, %173 : vector<8x32xf32>
    %cst_57 = arith.constant dense<0.000000e+00> : vector<32xf32>
    %175 = vector.multi_reduction <add>, %174, %cst_57 [0] : vector<8x32xf32> to vector<32xf32>
    %176 = vector.shape_cast %175 : vector<32xf32> to vector<1x32xf32>
    %cst_58 = arith.constant 1.250000e-01 : f32
    %177 = vector.broadcast %cst_58 : f32 to vector<1x32xf32>
    %178 = arith.mulf %176, %177 : vector<1x32xf32>
    %c419 = arith.constant 419 : index
    %c0_59 = arith.constant 0 : index
    %179 = vector.load %arg1[%c419, %c0_59] : memref<432x64xf32, #tpu.memory_space<vmem>>, vector<1x32xf32>
    %cst_60 = arith.constant 9.99999974E-6 : f32
    %180 = vector.broadcast %cst_60 : f32 to vector<1x32xf32>
    %181 = arith.addf %178, %180 : vector<1x32xf32>
    %182 = math.rsqrt %181 : vector<1x32xf32>
    %183 = arith.mulf %179, %182 : vector<1x32xf32>
    %184 = vector.broadcast %183 : vector<1x32xf32> to vector<8x32xf32>
    %185 = arith.mulf %173, %184 : vector<8x32xf32>
    %c420 = arith.constant 420 : index
    %c0_61 = arith.constant 0 : index
    %186 = vector.load %arg1[%c420, %c0_61] : memref<432x64xf32, #tpu.memory_space<vmem>>, vector<1x32xf32>
    %187 = vector.broadcast %186 : vector<1x32xf32> to vector<8x32xf32>
    %188 = arith.addf %185, %187 : vector<8x32xf32>
    %cst_62 = arith.constant 2.000000e-01 : f32
    %189 = vector.broadcast %cst_62 : f32 to vector<8x32xf32>
    %190 = arith.mulf %189, %188 : vector<8x32xf32>
    %191 = arith.maximumf %188, %190 : vector<8x32xf32>
    %c240 = arith.constant 240 : index
    %c0_63 = arith.constant 0 : index
    %192 = vector.load %arg1[%c240, %c0_63] : memref<432x64xf32, #tpu.memory_space<vmem>>, vector<32x2xf32>
    %cst_64 = arith.constant dense<0.000000e+00> : vector<8x2xf32>
    %193 = tpu.matmul %191, %192, %cst_64 {dimension_numbers = #tpu.dot_dimension_numbers<[1], [0], [0], [1], [0, 0, 1, 1], [], []>} : vector<8x32xf32>, vector<32x2xf32>, vector<8x2xf32> -> vector<8x2xf32>
    %c421 = arith.constant 421 : index
    %c0_65 = arith.constant 0 : index
    %194 = vector.load %arg1[%c421, %c0_65] : memref<432x64xf32, #tpu.memory_space<vmem>>, vector<1x2xf32>
    %195 = vector.broadcast %194 : vector<1x2xf32> to vector<8x2xf32>
    %196 = arith.addf %193, %195 : vector<8x2xf32>
    %c272 = arith.constant 272 : index
    %c0_66 = arith.constant 0 : index
    %197 = vector.load %arg1[%c272, %c0_66] : memref<432x64xf32, #tpu.memory_space<vmem>>, vector<4x32xf32>
    %198 = vector.extract_strided_slice %197 {offsets = [0, 0], sizes = [2, 32], strides = [1, 1]} : vector<4x32xf32> to vector<2x32xf32>
    %199 = vector.extract_strided_slice %103 {offsets = [0, 0], sizes = [8, 1], strides = [1, 1]} : vector<8x2xf32> to vector<8x1xf32>
    %200 = vector.extract_strided_slice %198 {offsets = [0, 0], sizes = [1, 32], strides = [1, 1]} : vector<2x32xf32> to vector<1x32xf32>
    %201 = vector.broadcast %199 : vector<8x1xf32> to vector<8x32xf32>
    %202 = vector.broadcast %200 : vector<1x32xf32> to vector<8x32xf32>
    %203 = arith.mulf %201, %202 : vector<8x32xf32>
    %204 = vector.extract_strided_slice %103 {offsets = [0, 1], sizes = [8, 1], strides = [1, 1]} : vector<8x2xf32> to vector<8x1xf32>
    %205 = vector.extract_strided_slice %198 {offsets = [1, 0], sizes = [1, 32], strides = [1, 1]} : vector<2x32xf32> to vector<1x32xf32>
    %206 = vector.broadcast %204 : vector<8x1xf32> to vector<8x32xf32>
    %207 = vector.broadcast %205 : vector<1x32xf32> to vector<8x32xf32>
    %208 = arith.mulf %206, %207 : vector<8x32xf32>
    %209 = arith.addf %203, %208 : vector<8x32xf32>
    %210 = vector.extract_strided_slice %197 {offsets = [2, 0], sizes = [2, 32], strides = [1, 1]} : vector<4x32xf32> to vector<2x32xf32>
    %211 = vector.extract_strided_slice %1 {offsets = [0, 0], sizes = [8, 1], strides = [1, 1]} : vector<8x2xf32> to vector<8x1xf32>
    %212 = vector.extract_strided_slice %210 {offsets = [0, 0], sizes = [1, 32], strides = [1, 1]} : vector<2x32xf32> to vector<1x32xf32>
    %213 = vector.broadcast %211 : vector<8x1xf32> to vector<8x32xf32>
    %214 = vector.broadcast %212 : vector<1x32xf32> to vector<8x32xf32>
    %215 = arith.mulf %213, %214 : vector<8x32xf32>
    %216 = vector.extract_strided_slice %1 {offsets = [0, 1], sizes = [8, 1], strides = [1, 1]} : vector<8x2xf32> to vector<8x1xf32>
    %217 = vector.extract_strided_slice %210 {offsets = [1, 0], sizes = [1, 32], strides = [1, 1]} : vector<2x32xf32> to vector<1x32xf32>
    %218 = vector.broadcast %216 : vector<8x1xf32> to vector<8x32xf32>
    %219 = vector.broadcast %217 : vector<1x32xf32> to vector<8x32xf32>
    %220 = arith.mulf %218, %219 : vector<8x32xf32>
    %221 = arith.addf %215, %220 : vector<8x32xf32>
    %222 = arith.addf %209, %221 : vector<8x32xf32>
    %cst_67 = arith.constant dense<0.000000e+00> : vector<32xf32>
    %223 = vector.multi_reduction <add>, %222, %cst_67 [0] : vector<8x32xf32> to vector<32xf32>
    %224 = vector.shape_cast %223 : vector<32xf32> to vector<1x32xf32>
    %cst_68 = arith.constant 1.250000e-01 : f32
    %225 = vector.broadcast %cst_68 : f32 to vector<1x32xf32>
    %226 = arith.mulf %224, %225 : vector<1x32xf32>
    %227 = vector.broadcast %226 : vector<1x32xf32> to vector<8x32xf32>
    %228 = arith.subf %222, %227 : vector<8x32xf32>
    %229 = arith.mulf %228, %228 : vector<8x32xf32>
    %cst_69 = arith.constant dense<0.000000e+00> : vector<32xf32>
    %230 = vector.multi_reduction <add>, %229, %cst_69 [0] : vector<8x32xf32> to vector<32xf32>
    %231 = vector.shape_cast %230 : vector<32xf32> to vector<1x32xf32>
    %cst_70 = arith.constant 1.250000e-01 : f32
    %232 = vector.broadcast %cst_70 : f32 to vector<1x32xf32>
    %233 = arith.mulf %231, %232 : vector<1x32xf32>
    %c422 = arith.constant 422 : index
    %c0_71 = arith.constant 0 : index
    %234 = vector.load %arg1[%c422, %c0_71] : memref<432x64xf32, #tpu.memory_space<vmem>>, vector<1x32xf32>
    %cst_72 = arith.constant 9.99999974E-6 : f32
    %235 = vector.broadcast %cst_72 : f32 to vector<1x32xf32>
    %236 = arith.addf %233, %235 : vector<1x32xf32>
    %237 = math.rsqrt %236 : vector<1x32xf32>
    %238 = arith.mulf %234, %237 : vector<1x32xf32>
    %239 = vector.broadcast %238 : vector<1x32xf32> to vector<8x32xf32>
    %240 = arith.mulf %228, %239 : vector<8x32xf32>
    %c423 = arith.constant 423 : index
    %c0_73 = arith.constant 0 : index
    %241 = vector.load %arg1[%c423, %c0_73] : memref<432x64xf32, #tpu.memory_space<vmem>>, vector<1x32xf32>
    %242 = vector.broadcast %241 : vector<1x32xf32> to vector<8x32xf32>
    %243 = arith.addf %240, %242 : vector<8x32xf32>
    %cst_74 = arith.constant 2.000000e-01 : f32
    %244 = vector.broadcast %cst_74 : f32 to vector<8x32xf32>
    %245 = arith.mulf %244, %243 : vector<8x32xf32>
    %246 = arith.maximumf %243, %245 : vector<8x32xf32>
    %c280 = arith.constant 280 : index
    %c0_75 = arith.constant 0 : index
    %247 = vector.load %arg1[%c280, %c0_75] : memref<432x64xf32, #tpu.memory_space<vmem>>, vector<32x64xf32>
    %cst_76 = arith.constant dense<0.000000e+00> : vector<8x64xf32>
    %248 = tpu.matmul %246, %247, %cst_76 {dimension_numbers = #tpu.dot_dimension_numbers<[1], [0], [0], [1], [0, 0, 1, 1], [], []>} : vector<8x32xf32>, vector<32x64xf32>, vector<8x64xf32> -> vector<8x64xf32>
    %cst_77 = arith.constant dense<0.000000e+00> : vector<64xf32>
    %249 = vector.multi_reduction <add>, %248, %cst_77 [0] : vector<8x64xf32> to vector<64xf32>
    %250 = vector.shape_cast %249 : vector<64xf32> to vector<1x64xf32>
    %cst_78 = arith.constant 1.250000e-01 : f32
    %251 = vector.broadcast %cst_78 : f32 to vector<1x64xf32>
    %252 = arith.mulf %250, %251 : vector<1x64xf32>
    %253 = vector.broadcast %252 : vector<1x64xf32> to vector<8x64xf32>
    %254 = arith.subf %248, %253 : vector<8x64xf32>
    %255 = arith.mulf %254, %254 : vector<8x64xf32>
    %cst_79 = arith.constant dense<0.000000e+00> : vector<64xf32>
    %256 = vector.multi_reduction <add>, %255, %cst_79 [0] : vector<8x64xf32> to vector<64xf32>
    %257 = vector.shape_cast %256 : vector<64xf32> to vector<1x64xf32>
    %cst_80 = arith.constant 1.250000e-01 : f32
    %258 = vector.broadcast %cst_80 : f32 to vector<1x64xf32>
    %259 = arith.mulf %257, %258 : vector<1x64xf32>
    %c424 = arith.constant 424 : index
    %c0_81 = arith.constant 0 : index
    %260 = vector.load %arg1[%c424, %c0_81] : memref<432x64xf32, #tpu.memory_space<vmem>>, vector<1x64xf32>
    %cst_82 = arith.constant 9.99999974E-6 : f32
    %261 = vector.broadcast %cst_82 : f32 to vector<1x64xf32>
    %262 = arith.addf %259, %261 : vector<1x64xf32>
    %263 = math.rsqrt %262 : vector<1x64xf32>
    %264 = arith.mulf %260, %263 : vector<1x64xf32>
    %265 = vector.broadcast %264 : vector<1x64xf32> to vector<8x64xf32>
    %266 = arith.mulf %254, %265 : vector<8x64xf32>
    %c425 = arith.constant 425 : index
    %c0_83 = arith.constant 0 : index
    %267 = vector.load %arg1[%c425, %c0_83] : memref<432x64xf32, #tpu.memory_space<vmem>>, vector<1x64xf32>
    %268 = vector.broadcast %267 : vector<1x64xf32> to vector<8x64xf32>
    %269 = arith.addf %266, %268 : vector<8x64xf32>
    %cst_84 = arith.constant 2.000000e-01 : f32
    %270 = vector.broadcast %cst_84 : f32 to vector<8x64xf32>
    %271 = arith.mulf %270, %269 : vector<8x64xf32>
    %272 = arith.maximumf %269, %271 : vector<8x64xf32>
    %c312 = arith.constant 312 : index
    %c0_85 = arith.constant 0 : index
    %273 = vector.load %arg1[%c312, %c0_85] : memref<432x64xf32, #tpu.memory_space<vmem>>, vector<64x32xf32>
    %cst_86 = arith.constant dense<0.000000e+00> : vector<8x32xf32>
    %274 = tpu.matmul %272, %273, %cst_86 {dimension_numbers = #tpu.dot_dimension_numbers<[1], [0], [0], [1], [0, 0, 1, 1], [], []>} : vector<8x64xf32>, vector<64x32xf32>, vector<8x32xf32> -> vector<8x32xf32>
    %cst_87 = arith.constant dense<0.000000e+00> : vector<32xf32>
    %275 = vector.multi_reduction <add>, %274, %cst_87 [0] : vector<8x32xf32> to vector<32xf32>
    %276 = vector.shape_cast %275 : vector<32xf32> to vector<1x32xf32>
    %cst_88 = arith.constant 1.250000e-01 : f32
    %277 = vector.broadcast %cst_88 : f32 to vector<1x32xf32>
    %278 = arith.mulf %276, %277 : vector<1x32xf32>
    %279 = vector.broadcast %278 : vector<1x32xf32> to vector<8x32xf32>
    %280 = arith.subf %274, %279 : vector<8x32xf32>
    %281 = arith.mulf %280, %280 : vector<8x32xf32>
    %cst_89 = arith.constant dense<0.000000e+00> : vector<32xf32>
    %282 = vector.multi_reduction <add>, %281, %cst_89 [0] : vector<8x32xf32> to vector<32xf32>
    %283 = vector.shape_cast %282 : vector<32xf32> to vector<1x32xf32>
    %cst_90 = arith.constant 1.250000e-01 : f32
    %284 = vector.broadcast %cst_90 : f32 to vector<1x32xf32>
    %285 = arith.mulf %283, %284 : vector<1x32xf32>
    %c426 = arith.constant 426 : index
    %c0_91 = arith.constant 0 : index
    %286 = vector.load %arg1[%c426, %c0_91] : memref<432x64xf32, #tpu.memory_space<vmem>>, vector<1x32xf32>
    %cst_92 = arith.constant 9.99999974E-6 : f32
    %287 = vector.broadcast %cst_92 : f32 to vector<1x32xf32>
    %288 = arith.addf %285, %287 : vector<1x32xf32>
    %289 = math.rsqrt %288 : vector<1x32xf32>
    %290 = arith.mulf %286, %289 : vector<1x32xf32>
    %291 = vector.broadcast %290 : vector<1x32xf32> to vector<8x32xf32>
    %292 = arith.mulf %280, %291 : vector<8x32xf32>
    %c427 = arith.constant 427 : index
    %c0_93 = arith.constant 0 : index
    %293 = vector.load %arg1[%c427, %c0_93] : memref<432x64xf32, #tpu.memory_space<vmem>>, vector<1x32xf32>
    %294 = vector.broadcast %293 : vector<1x32xf32> to vector<8x32xf32>
    %295 = arith.addf %292, %294 : vector<8x32xf32>
    %cst_94 = arith.constant 2.000000e-01 : f32
    %296 = vector.broadcast %cst_94 : f32 to vector<8x32xf32>
    %297 = arith.mulf %296, %295 : vector<8x32xf32>
    %298 = arith.maximumf %295, %297 : vector<8x32xf32>
    %c376 = arith.constant 376 : index
    %c0_95 = arith.constant 0 : index
    %299 = vector.load %arg1[%c376, %c0_95] : memref<432x64xf32, #tpu.memory_space<vmem>>, vector<32x1xf32>
    %cst_96 = arith.constant dense<0.000000e+00> : vector<8x1xf32>
    %300 = tpu.matmul %298, %299, %cst_96 {dimension_numbers = #tpu.dot_dimension_numbers<[1], [0], [0], [1], [0, 0, 1, 1], [], []>} : vector<8x32xf32>, vector<32x1xf32>, vector<8x1xf32> -> vector<8x1xf32>
    %c428 = arith.constant 428 : index
    %c0_97 = arith.constant 0 : index
    %301 = vector.load %arg1[%c428, %c0_97] : memref<432x64xf32, #tpu.memory_space<vmem>>, vector<1x1xf32>
    %302 = vector.broadcast %301 : vector<1x1xf32> to vector<8x1xf32>
    %303 = arith.addf %300, %302 : vector<8x1xf32>
    %cst_98 = arith.constant 0.000000e+00 : f32
    %304 = vector.broadcast %cst_98 : f32 to vector<8x3xf32>
    %305 = tpu.concatenate %196, %303, %103, %304 in 1 : vector<8x2xf32>, vector<8x1xf32>, vector<8x2xf32>, vector<8x3xf32> -> vector<8x8xf32>
    %c0_99 = arith.constant 0 : index
    %c0_100 = arith.constant 0 : index
    %306 = vector.load %arg2[%c0_99, %c0_100] : memref<8x8xf32, #tpu.memory_space<vmem>>, vector<8x8xf32>
    tpu.vector_store %arg2[%c0_99, %c0_100], %305 {strides = array<i32>} : memref<8x8xf32, #tpu.memory_space<vmem>>, vector<8x8xf32>,
    return
  }
}

</mosaic_0001>

<bundles_post_ra>
// kernel: forward.1
= control target key start
LH: loop header
LB: loop body
LE: loop exit
PB: predicated region body
PF: predicated region fallthrough
CT: control target
= control target key end

     0   :  { %v1463_v0 = vmov 2   ;;  %v1464_v2 = vmov 3   ;;  %v1465_v6 = vmov 0.0|0.0   ;;  %vm1466_vm0 = vmmov 0   ;;  %s1468_s29 = smov 2   ;;  %s1471_s30 = smov 124   ;;  %s1824_s0 = inlined_call_operand.vmem [shape: f32[8,6], index: 0, kind: input, shape index: {}]   ;;  %s1825_s1 = inlined_call_operand.vmem [shape: f32[432,64], index: 1, kind: input, shape index: {}]   ;;  %s1826_s2 = inlined_call_operand.vmem [shape: f32[8,8], index: 2, kind: output, shape index: {}]  }
   0x1   :  { %1438 = vset.pattern.permute.xlu0 %v1463_v0  ;;  %v1491_v1 = vld [vmem:[%s1824_s0] sm:$0xff]  ;;  %v69_v3 = vld [vmem:[%s1825_s1 + $0x8] sm:$0xff]  ;;  %v70_v4 = vld [vmem:[%s1825_s1 + $0x10] sm:$0xff]  ;;  %1356 = vmatprep.subr.bf16.mxu0 %v1465_v6  ;;  %v1467_v10 = vmov 0.0   ;;  %v18_v11 = vlaneseq  ;;  %vm33_vm1 = vcmask 261120   ;;  %vm146_vm2 = vcmask 523264  }
   0x2   :  { %15 = vperm.xlu0 %1438, %v1491_v1   ;;  %v1357_v5 = vpack.c.bf16 %v70_v4, %v69_v3  ;;  %1362 = vmatprep.subr.bf16.mxu1 %v1465_v6  ;;  %v71_v7 = vld [vmem:[%s1825_s1 + $0x18] sm:$0xff]  ;;  %v72_v8 = vld [vmem:[%s1825_s1 + $0x20] sm:$0xff]  ;;  %v182_v51 = vld [vmem:[%s1825_s1 + $0x28] sm:$0xff]  ;;  %s1472_s3 = smov 3   ;;  %vm1143_vm3 = vcmask 15360   ;;  %vm1145_vm4 = vcmask 23552  }
   0x3   :  { %v1360_v9 = vpack.c.bf16 %v72_v8, %v71_v7  ;;  %1241 = vmatprep.mubr.msk.f32.mxu0 %vm1466_vm0, %v1467_v10  ;;  %1260 = vmatprep.mubr.msk.f32.mxu1 %vm1466_vm0, %v1467_v10  ;;  %v1515_v12 = vshrl.u32 %v18_v11, 7  ;;  %v12_v15 = vld [vmem:[%s1825_s1] sm:$0x3]  ;;  %v52_v42 = vld [vmem:[%s1825_s1 + $0x198] sm:$0x1]  ;;  %v183_v52 = vld [vmem:[%s1825_s1 + $0x30] sm:$0xff] }
   0x4   :  { %1358 = vmatpush3.bf16.msra.mxu0 %v1357_v5  ;;  %v1155_v46 = vld [vmem:[%s1825_s1 + $0x199] ss:$0 sm:$0xff]  ;;  %v1363_v53 = vpack.c.bf16 %v183_v52, %v182_v51  ;;  %v185_v55 = vld [vmem:[%s1825_s1 + $0x40] sm:$0xff]  ;;  %v186_v57 = vld [vmem:[%s1825_s1 + $0x48] sm:$0xff]  ;;  %vm1147_vm5 = vcmask 39936   ;;  %vm1149_vm6 = vcmask 64512  }
   0x5   :  { %1359 = vmatprep.subr.bf16.mxu0 %v1465_v6  ;;  %v1518_v13 = vsub.s32 0, %v1515_v12  ;;  %v1521_v14 = vsub.s32 1, %v1515_v12  ;;  %v184_v54 = vld [vmem:[%s1825_s1 + $0x38] sm:$0xff]  ;;  %v187_v58 = vld [vmem:[%s1825_s1 + $0x50] sm:$0xff]  ;;  %v189_v61 = vld [vmem:[%s1825_s1 + $0x60] sm:$0xff] }
   0x6   :  { %1439 = vset.pattern.permute.xlu0 %v1464_v2  ;;  %1364 = vmatpush3.bf16.msra.mxu1 %v1363_v53  ;;  %v1366_v56 = vpack.c.bf16 %v185_v55, %v184_v54  ;;  %v1369_v59 = vpack.c.bf16 %v187_v58, %v186_v57  ;;  %v188_v60 = vld [vmem:[%s1825_s1 + $0x58] sm:$0xff] }
   0x7   :  { %24 = vperm.xlu0 %1439, %v1491_v1   ;;  %v21_v17 = vrot.slane %v12_v15, %v1518_v13  ;;  %v30_v18 = vrot.slane %v12_v15, %v1521_v14  ;;  %1365 = vmatprep.subr.bf16.mxu1 %v1465_v6  ;;  %v1372_v62 = vpack.c.bf16 %v189_v61, %v188_v60 }
   0x8   :  { %1361 = vmatpush3.bf16.msra.mxu0 %v1360_v9 }
   0x9   :  { %1374 = vmatprep.subr.bf16.mxu0 %v1465_v6 }
   0xa   :  { %1367 = vmatpush3.bf16.msra.mxu1 %v1366_v56 }
   0xb   :  { %1368 = vmatprep.subr.bf16.mxu1 %v1465_v6 }
   0xe   :  { %1370 = vmatpush3.bf16.msra.mxu1 %v1369_v59 }
   0xf   :  { %1371 = vmatprep.subr.bf16.mxu1 %v1465_v6 }
  0x12   :  { %1373 = vmatpush3.bf16.msra.mxu1 %v1372_v62  ;;  %v281_v62 = vld [vmem:[%s1825_s1 + $0x19c] sm:$0x1] }
  0x13   :  { %1386 = vmatprep.subr.bf16.mxu1 %v1465_v6 }
  0x81   :  { %v16_v16 = vpop.permute.xlu0 %15 }
  0x82   :  { %v22_v20 = vmul.f32 %v21_v17, %v16_v16 }
  0x86   :  { %v25_v19 = vpop.permute.xlu0 %24 }
  0x87   :  { %v31_v21 = vmul.f32 %v30_v18, %v25_v19 }
  0x89   :  { %v32_v22 = vadd.f32 %v31_v21, %v22_v20 }
  0x8b   :  { %v34_v23 = vsel %vm33_vm1, %v32_v22, 0.0 }
  0x8c   :  { %v35_v24 = vrot.slane %v34_v23, 4 }
  0x8e   :  { %v36_v25 = vadd.f32 %v35_v24, %v34_v23 }
  0x90   :  { %v37_v26 = vrot.slane %v36_v25, 2 }
  0x92   :  { %v38_v27 = vadd.f32 %v37_v26, %v36_v25  ;;  %v165_v26 = vld [vmem:[%s1825_s1 + $0x19a] sm:$0x1] }
  0x94   :  { %v39_v28 = vrot.slane %v38_v27, 1 }
  0x96   :  { %v40_v29 = vadd.f32 %v39_v28, %v38_v27 }
  0x98   :  { %v41_v30 = vmul.f32 0.125, %v40_v29 }
  0x9a   :  { %v42_v31 = vsub.f32 %v32_v22, %v41_v30  ;;  %v1157_v30 = vld [vmem:[%s1825_s1 + $0x19b] ss:$0 sm:$0xff] }
  0x9c   :  { %v43_v32 = vmul.f32 %v42_v31, %v42_v31 }
  0x9e   :  { %v44_v33 = vsel %vm33_vm1, %v43_v32, 0.0 }
  0x9f   :  { %v45_v34 = vrot.slane %v44_v33, 4 }
  0xa1   :  { %v46_v35 = vadd.f32 %v45_v34, %v44_v33 }
  0xa3   :  { %v47_v36 = vrot.slane %v46_v35, 2 }
  0xa5   :  { %v48_v37 = vadd.f32 %v47_v36, %v46_v35  ;;  %v298_v35 = vld [vmem:[%s1825_s1 + $0x68] sm:$0xff]  ;;  %v299_v36 = vld [vmem:[%s1825_s1 + $0x70] sm:$0xff] }
  0xa7   :  { %v49_v38 = vrot.slane %v48_v37, 1 }
  0xa9   :  { %v50_v39 = vadd.f32 %v49_v38, %v48_v37  ;;  %v1375_v37 = vpack.c.bf16 %v299_v36, %v298_v35  ;;  %v300_v38 = vld [vmem:[%s1825_s1 + $0x78] sm:$0xff] }
  0xab   :  { %v51_v40 = vmul.f32 0.125, %v50_v39  ;;  %v301_v39 = vld [vmem:[%s1825_s1 + $0x80] sm:$0xff] }
  0xad   :  { %v53_v41 = vadd.f32 1e-05, %v51_v40  ;;  %v1378_v40 = vpack.c.bf16 %v301_v39, %v300_v38 }
  0xaf   :  { %1443 = vrsqrt.f32 %v53_v41 }
  0xb9   :  { %v1444_v43 = vpop.eup %1443 }
  0xba   :  { %v55_v44 = vmul.f32 %v1444_v43, %v52_v42 }
  0xbc   :  { %v59_v45 = vrot.slane %v55_v44, %v1518_v13 }
  0xbe   :  { %v60_v47 = vmul.f32 %v59_v45, %v42_v31 }
  0xc0   :  { %v66_v48 = vadd.f32 %v1155_v46, %v60_v47 }
  0xc2   :  { %v67_v49 = vmul.f32 0.2, %v66_v48 }
  0xc4   :  { %v68_v50 = vmax.f32 %v66_v48, %v67_v49 }
  0xc6   :  { %1242 = vmatmul.mubr.msk.f32.vlgmr.msra.gmra.mrb[0].mxu0 %vm33_vm1, %v68_v50 }
  0xc7   :  { %1271 = vmatprep.mubr.msk.f32.mxu0 %vm1466_vm0, %v1467_v10  ;;  %1376 = vmatpush3.bf16.msra.mxu0 %v1375_v37 }
  0xc8   :  { %1377 = vmatprep.subr.bf16.mxu0 %v1465_v6 }
  0xcb   :  { %1379 = vmatpush3.bf16.msra.mxu0 %v1378_v40 }
  0xcc   :  { %1380 = vmatprep.subr.bf16.mxu0 %v1465_v6 }
 0x199   :  { %v142_v63 = vpop.f32.mrb[0].mxu0 }
 0x19a   :  { %v147_v0 = vsel %vm146_vm2, %v142_v63, 0.0  ;;  %v1243_v2 = vpop.f32.mrb[1].mxu0 }
 0x19b   :  { %v148_v3 = vrot.slane %v147_v0, 4 }
 0x19d   :  { %v149_v4 = vadd.f32 %v148_v3, %v147_v0  ;;  %v1159_v3 = vld [vmem:[%s1825_s1 + $0x19d] ss:$0 sm:$0xff] }
 0x19f   :  { %v150_v5 = vrot.slane %v149_v4, 2 }
 0x1a1   :  { %v151_v7 = vadd.f32 %v150_v5, %v149_v4 }
 0x1a3   :  { %v152_v8 = vrot.slane %v151_v7, 1 }
 0x1a5   :  { %v153_v9 = vadd.f32 %v152_v8, %v151_v7 }
 0x1a7   :  { %v154_v11 = vmul.f32 0.125, %v153_v9  ;;  %v1160_v9 = vld [vmem:[%s1825_s1 + $0x19e] ss:$0 sm:$0xff] }
 0x1a9   :  { %v155_v15 = vsub.f32 %v142_v63, %v154_v11 }
 0x1ab   :  { %v156_v16 = vmul.f32 %v155_v15, %v155_v15 }
 0x1ad   :  { %v157_v17 = vsel %vm146_vm2, %v156_v16, 0.0 }
 0x1ae   :  { %v158_v18 = vrot.slane %v157_v17, 4 }
 0x1b0   :  { %v159_v19 = vadd.f32 %v158_v18, %v157_v17 }
 0x1b2   :  { %v160_v20 = vrot.slane %v159_v19, 2 }
 0x1b4   :  { %v161_v21 = vadd.f32 %v160_v20, %v159_v19  ;;  %v1469_v20 = vmov 0  }
 0x1b5   :  { %1440 = vset.pattern.permute.xlu1 %v1469_v20 }
 0x1b6   :  { %v162_v22 = vrot.slane %v161_v21, 1 }
 0x1b8   :  { %v163_v23 = vadd.f32 %v162_v22, %v161_v21  ;;  %v1470_v21 = vmov 1  }
 0x1b9   :  { %1441 = vset.pattern.permute.xlu0 %v1470_v21 }
 0x1ba   :  { %v164_v24 = vmul.f32 0.125, %v163_v23 }
 0x1bc   :  { %v166_v25 = vadd.f32 1e-05, %v164_v24 }
 0x1be   :  { %1445 = vrsqrt.f32 %v166_v25 }
 0x1c8   :  { %v1446_v27 = vpop.eup %1445 }
 0x1c9   :  { %v168_v28 = vmul.f32 %v1446_v27, %v165_v26  ;;  %v449_v26 = vld [vmem:[%s1825_s1 + $0x90] sm:$0xff]  ;;  %v450_v27 = vld [vmem:[%s1825_s1 + $0x98] sm:$0xff] }
 0x1cb   :  { %v172_v29 = vrot.slane %v168_v28, %v1518_v13  ;;  %v1381_v28 = vpack.c.bf16 %v450_v27, %v449_v26 }
 0x1cd   :  { %v173_v31 = vmul.f32 %v172_v29, %v155_v15  ;;  %v451_v29 = vld [vmem:[%s1825_s1 + $0xa0] sm:$0xff] }
 0x1cf   :  { %v179_v32 = vadd.f32 %v1157_v30, %v173_v31  ;;  %v393_v31 = vld [vmem:[%s1825_s1 + $0x88] sm:$0x3] }
 0x1d1   :  { %v180_v33 = vmul.f32 0.2, %v179_v32 }
 0x1d3   :  { %v181_v34 = vmax.f32 %v179_v32, %v180_v33  ;;  %v411_v32 = vrot.slane %v393_v31, %v1521_v14  ;;  %v402_v33 = vrot.slane %v393_v31, %v1518_v13 }
 0x1d5   :  { %1261 = vmatmul.mubr.msk.f32.vlgmr.msra.gmra.mrb[0].mxu1 %vm146_vm2, %v181_v34 }
 0x1d6   :  { %1301 = vmatprep.mubr.msk.f32.mxu1 %vm1466_vm0, %v1467_v10 }
 0x2a8   :  { %v259_v41 = vpop.f32.mrb[0].mxu1 }
 0x2a9   :  { %v263_v42 = vsel %vm33_vm1, %v259_v41, 0.0  ;;  %v1262_v43 = vpop.f32.mrb[1].mxu1 }
 0x2aa   :  { %v264_v44 = vrot.slane %v263_v42, 4 }
 0x2ac   :  { %v265_v45 = vadd.f32 %v264_v44, %v263_v42 }
 0x2ae   :  { %v266_v46 = vrot.slane %v265_v45, 2 }
 0x2b0   :  { %v267_v47 = vadd.f32 %v266_v46, %v265_v45 }
 0x2b2   :  { %v268_v48 = vrot.slane %v267_v47, 1 }
 0x2b4   :  { %v269_v49 = vadd.f32 %v268_v48, %v267_v47 }
 0x2b6   :  { %v270_v50 = vmul.f32 0.125, %v269_v49 }
 0x2b8   :  { %v271_v51 = vsub.f32 %v259_v41, %v270_v50 }
 0x2ba   :  { %v272_v52 = vmul.f32 %v271_v51, %v271_v51 }
 0x2bc   :  { %v273_v53 = vsel %vm33_vm1, %v272_v52, 0.0 }
 0x2bd   :  { %v274_v54 = vrot.slane %v273_v53, 4 }
 0x2bf   :  { %v275_v55 = vadd.f32 %v274_v54, %v273_v53 }
 0x2c1   :  { %v276_v56 = vrot.slane %v275_v55, 2 }
 0x2c3   :  { %v277_v57 = vadd.f32 %v276_v56, %v275_v55 }
 0x2c5   :  { %v278_v58 = vrot.slane %v277_v57, 1 }
 0x2c7   :  { %v279_v59 = vadd.f32 %v278_v58, %v277_v57  ;;  %v432_v58 = vld [vmem:[%s1825_s1 + $0x19f] sm:$0x1] }
 0x2c9   :  { %v280_v60 = vmul.f32 0.125, %v279_v59 }
 0x2cb   :  { %v282_v61 = vadd.f32 1e-05, %v280_v60 }
 0x2cd   :  { %1447 = vrsqrt.f32 %v282_v61 }
 0x2d7   :  { %v1448_v63 = vpop.eup %1447 }
 0x2d8   :  { %v284_v0 = vmul.f32 %v1448_v63, %v281_v62  ;;  %v1162_v62 = vld [vmem:[%s1825_s1 + $0x1a0] ss:$0 sm:$0xff] }
 0x2da   :  { %v288_v2 = vrot.slane %v284_v0, %v1518_v13 }
 0x2dc   :  { %v289_v4 = vmul.f32 %v288_v2, %v271_v51 }
 0x2de   :  { %v295_v5 = vadd.f32 %v1159_v3, %v289_v4  ;;  %v561_v4 = vld [vmem:[%s1825_s1 + $0xb0] sm:$0xff] }
 0x2e0   :  { %v296_v7 = vmul.f32 0.2, %v295_v5 }
 0x2e2   :  { %v297_v8 = vmax.f32 %v295_v5, %v296_v7  ;;  %v562_v5 = vld [vmem:[%s1825_s1 + $0xb8] sm:$0xff] }
 0x2e3   :  { %v1387_v7 = vpack.c.bf16 %v562_v5, %v561_v4 }
 0x2e4   :  { %1272 = vmatmul.mubr.msk.f32.vlgmr.msra.gmra.mrb[2].mxu0 %vm33_vm1, %v297_v8  ;;  %v563_v8 = vld [vmem:[%s1825_s1 + $0xc0] sm:$0xff] }
 0x2e5   :  { %1282 = vmatprep.mubr.msk.f32.mxu0 %vm1466_vm0, %v1467_v10  ;;  %1382 = vmatpush3.bf16.msra.mxu0 %v1381_v28 }
 0x2e6   :  { %1383 = vmatprep.subr.bf16.mxu0 %v1465_v6  ;;  %1388 = vmatpush3.bf16.msra.mxu1 %v1387_v7 }
 0x2e7   :  { %1389 = vmatprep.subr.bf16.mxu1 %v1465_v6 }
 0x3b7   :  { %v376_v11 = vpop.f32.mrb[2].mxu0 }
 0x3b8   :  { %v377_v15 = vadd.f32 %v1160_v9, %v376_v11  ;;  %v1273_v16 = vpop.f32.mrb[3].mxu0  ;;  %v564_v9 = vld [vmem:[%s1825_s1 + $0xc8] sm:$0xff] }
 0x3b9   :  { %v1390_v11 = vpack.c.bf16 %v564_v9, %v563_v8  ;;  %v566_v16 = vld [vmem:[%s1825_s1 + $0xd8] sm:$0xff] }
 0x3ba   :  { %v380_v17 = vmul.f32 0.5, %v377_v15 }
 0x3bb   :  { %1391 = vmatpush3.bf16.msra.mxu1 %v1390_v11 }
 0x3bc   :  { %v381_v18 = vmul.f32 1.442695, %v380_v17  ;;  %1392 = vmatprep.subr.bf16.mxu1 %v1465_v6 }
 0x3be   :  { %1449 = vpow2.f32 %v381_v18  ;;  %v567_v18 = vld [vmem:[%s1825_s1 + $0xe0] sm:$0xff] }
 0x3c8   :  { %v1450_v19 = vpop.eup %1449 }
 0x3c9   :  { %384 = vrot.lane.b32.xlu1 %v1450_v19, %s1468_s29  ;;  %v568_v19 = vld [vmem:[%s1825_s1 + $0xe8] sm:$0xff] }
 0x3ca   :  { %v1396_v20 = vpack.c.bf16 %v568_v19, %v567_v18 }
 0x43b   :  { %v385_v22 = vpop.permute.xlu1 %384 }
 0x43c   :  { %v387_v23 = vmul.f32 %v385_v22, %v1491_v1 }
 0x43e   :  { %389 = vrot.lane.b32.xlu1 %v387_v23, %s1471_s30 }
 0x4b0   :  { %v390_v24 = vpop.permute.xlu1 %389 }
 0x4b1   :  { %v392_v25 = vadd.f32 %v390_v24, %v377_v15  ;;  %v565_v15 = vld [vmem:[%s1825_s1 + $0xd0] sm:$0xff] }
 0x4b2   :  { %v1393_v17 = vpack.c.bf16 %v566_v16, %v565_v15 }
 0x4b3   :  { %405 = vperm.xlu0 %1441, %v392_v25   ;;  %396 = vperm.xlu1 %1440, %v392_v25  }
 0x4b4   :  { %1394 = vmatpush3.bf16.msra.mxu1 %v1393_v17 }
 0x4b5   :  { %1395 = vmatprep.subr.bf16.mxu1 %v1465_v6 }
 0x4b7   :  { %772 = vperm.xlu1 %1440, %v1491_v1  }
 0x4b8   :  { %1397 = vmatpush3.bf16.msra.mxu1 %v1396_v20 }
 0x4b9   :  { %1410 = vmatprep.subr.bf16.mxu1 %v1465_v6 }
 0x4bb   :  { %1442 = vset.pattern.permute.xlu1 %v1470_v21 }
 0x4bc   :  { %781 = vperm.xlu1 %1442, %v1491_v1   ;;  %v452_v1 = vld [vmem:[%s1825_s1 + $0xa8] sm:$0xff] }
 0x4bd   :  { %v1384_v30 = vpack.c.bf16 %v452_v1, %v451_v29 }
 0x4bf   :  { %1385 = vmatpush3.bf16.msra.mxu0 %v1384_v30 }
 0x4c0   :  { %1140 = vrot.lane.b32.xlu1 %v392_v25, %s1472_s3  ;;  %1398 = vmatprep.subr.bf16.mxu0 %v1465_v6 }
 0x532   :  { %v1632_v34 = vpop.permute.xlu0 %405  ;;  %v1634_v35 = vpop.permute.xlu1 %396 }
 0x533   :  { %v412_v36 = vmul.f32 %v411_v32, %v1632_v34  ;;  %v403_v37 = vmul.f32 %v402_v33, %v1634_v35 }
 0x535   :  { %v413_v38 = vadd.f32 %v412_v36, %v403_v37 }
 0x537   :  { %v414_v39 = vsel %vm33_vm1, %v413_v38, 0.0 }
 0x538   :  { %v415_v40 = vrot.slane %v414_v39, 4 }
 0x53a   :  { %v416_v41 = vadd.f32 %v415_v40, %v414_v39 }
 0x53c   :  { %v417_v42 = vrot.slane %v416_v41, 2 }
 0x53e   :  { %v418_v43 = vadd.f32 %v417_v42, %v416_v41 }
 0x540   :  { %v419_v44 = vrot.slane %v418_v43, 1 }
 0x542   :  { %v420_v45 = vadd.f32 %v419_v44, %v418_v43  ;;  %v544_v43 = vld [vmem:[%s1825_s1 + $0x1a1] sm:$0x1] }
 0x544   :  { %v421_v46 = vmul.f32 0.125, %v420_v45 }
 0x546   :  { %v422_v47 = vsub.f32 %v413_v38, %v421_v46 }
 0x548   :  { %v423_v48 = vmul.f32 %v422_v47, %v422_v47 }
 0x54a   :  { %v424_v49 = vsel %vm33_vm1, %v423_v48, 0.0 }
 0x54b   :  { %v425_v50 = vrot.slane %v424_v49, 4 }
 0x54d   :  { %v426_v51 = vadd.f32 %v425_v50, %v424_v49 }
 0x54f   :  { %v427_v52 = vrot.slane %v426_v51, 2 }
 0x551   :  { %v428_v53 = vadd.f32 %v427_v52, %v426_v51  ;;  %v677_v52 = vld [vmem:[%s1825_s1 + $0xf0] sm:$0xff] }
 0x553   :  { %v429_v54 = vrot.slane %v428_v53, 1 }
 0x555   :  { %v430_v55 = vadd.f32 %v429_v54, %v428_v53  ;;  %v678_v53 = vld [vmem:[%s1825_s1 + $0xf8] sm:$0xff] }
 0x556   :  { %v1399_v54 = vpack.c.bf16 %v678_v53, %v677_v52 }
 0x557   :  { %v431_v56 = vmul.f32 0.125, %v430_v55  ;;  %v679_v55 = vld [vmem:[%s1825_s1 + $0x100] sm:$0xff] }
 0x559   :  { %v433_v57 = vadd.f32 1e-05, %v431_v56  ;;  %v680_v56 = vld [vmem:[%s1825_s1 + $0x108] sm:$0xff] }
 0x55b   :  { %1451 = vrsqrt.f32 %v433_v57  ;;  %v1402_v57 = vpack.c.bf16 %v680_v56, %v679_v55  ;;  %v660_v55 = vld [vmem:[%s1825_s1 + $0x1a3] sm:$0x1] }
 0x565   :  { %v1452_v59 = vpop.eup %1451 }
 0x566   :  { %v435_v60 = vmul.f32 %v1452_v59, %v432_v58  ;;  %v773_v58 = vpop.permute.xlu1 %772  ;;  %v786_v59 = vsub.s32 3, %v1515_v12 }
 0x568   :  { %v439_v61 = vrot.slane %v435_v60, %v1518_v13  ;;  %v777_v60 = vsub.s32 2, %v1515_v12 }
 0x56a   :  { %v440_v63 = vmul.f32 %v439_v61, %v422_v47  ;;  %v1164_v47 = vld [vmem:[%s1825_s1 + $0x1a2] ss:$0 sm:$0xff]  ;;  %v759_v61 = vld [vmem:[%s1825_s1 + $0x110] sm:$0xf] }
 0x56c   :  { %v446_v0 = vadd.f32 %v1162_v62, %v440_v63  ;;  %v787_v62 = vrot.slane %v759_v61, %v786_v59  ;;  %v782_v63 = vpop.permute.xlu1 %781 }
 0x56e   :  { %v447_v2 = vmul.f32 0.2, %v446_v0  ;;  %v788_v4 = vmul.f32 %v787_v62, %v782_v63 }
 0x570   :  { %v448_v3 = vmax.f32 %v446_v0, %v447_v2  ;;  %v768_v0 = vrot.slane %v759_v61, %v1521_v14  ;;  %v763_v2 = vrot.slane %v759_v61, %v1518_v13 }
 0x572   :  { %1283 = vmatmul.mubr.msk.f32.vlgmr.msra.gmra.mrb[4].mxu0 %vm33_vm1, %v448_v3  ;;  %v778_v3 = vrot.slane %v759_v61, %v777_v60  ;;  %v769_v5 = vmul.f32 %v768_v0, %v1632_v34  ;;  %v764_v7 = vmul.f32 %v763_v2, %v1634_v35  ;;  %v1166_v61 = vld [vmem:[%s1825_s1 + $0x1a4] ss:$0 sm:$0xff]  ;;  %v826_v2 = vld [vmem:[%s1825_s1 + $0x118] sm:$0xff] }
 0x573   :  { %1312 = vmatprep.mubr.msk.f32.mxu0 %vm1466_vm0, %v1467_v10  ;;  %1400 = vmatpush3.bf16.msra.mxu0 %v1399_v54  ;;  %v809_v54 = vld [vmem:[%s1825_s1 + $0x1a6] sm:$0x1] }
 0x574   :  { %1401 = vmatprep.subr.bf16.mxu0 %v1465_v6  ;;  %v779_v8 = vmul.f32 %v778_v3, %v773_v58  ;;  %v770_v11 = vadd.f32 %v769_v5, %v764_v7  ;;  %v827_v3 = vld [vmem:[%s1825_s1 + $0x120] sm:$0xff] }
 0x575   :  { %v1405_v7 = vpack.c.bf16 %v827_v3, %v826_v2 }
 0x576   :  { %v789_v9 = vadd.f32 %v788_v4, %v779_v8  ;;  %v1169_v4 = vld [vmem:[%s1825_s1 + $0x1a7] ss:$0 sm:$0xff] }
 0x577   :  { %1403 = vmatpush3.bf16.msra.mxu0 %v1402_v57 }
 0x578   :  { %1404 = vmatprep.subr.bf16.mxu0 %v1465_v6  ;;  %v790_v12 = vadd.f32 %v789_v9, %v770_v11  ;;  %v828_v11 = vld [vmem:[%s1825_s1 + $0x128] sm:$0xff] }
 0x57a   :  { %v791_v15 = vsel %vm33_vm1, %v790_v12, 0.0 }
 0x57b   :  { %v792_v16 = vrot.slane %v791_v15, 4 }
 0x57d   :  { %v793_v17 = vadd.f32 %v792_v16, %v791_v15 }
 0x57f   :  { %v794_v18 = vrot.slane %v793_v17, 2 }
 0x581   :  { %v795_v19 = vadd.f32 %v794_v18, %v793_v17  ;;  %v938_v18 = vld [vmem:[%s1825_s1 + $0x138] sm:$0xff] }
 0x583   :  { %v796_v20 = vrot.slane %v795_v19, 1 }
 0x585   :  { %v797_v14 = vadd.f32 %v796_v20, %v795_v19  ;;  %v939_v19 = vld [vmem:[%s1825_s1 + $0x140] sm:$0xff] }
 0x586   :  { %v1411_v20 = vpack.c.bf16 %v939_v19, %v938_v18 }
 0x645   :  { %v522_v21 = vpop.f32.mrb[4].mxu0 }
 0x646   :  { %v526_v22 = vsel %vm146_vm2, %v522_v21, 0.0  ;;  %v1284_v23 = vpop.f32.mrb[5].mxu0 }
 0x647   :  { %v527_v24 = vrot.slane %v526_v22, 4 }
 0x649   :  { %v528_v25 = vadd.f32 %v527_v24, %v526_v22 }
 0x64b   :  { %v529_v26 = vrot.slane %v528_v25, 2 }
 0x64d   :  { %v530_v27 = vadd.f32 %v529_v26, %v528_v25 }
 0x64f   :  { %v531_v28 = vrot.slane %v530_v27, 1 }
 0x651   :  { %v532_v29 = vadd.f32 %v531_v28, %v530_v27 }
 0x653   :  { %v533_v1 = vmul.f32 0.125, %v532_v29 }
 0x655   :  { %v534_v30 = vsub.f32 %v522_v21, %v533_v1  ;;  %v798_v21 = vmul.f32 0.125, %v797_v14  ;;  %v940_v14 = vld [vmem:[%s1825_s1 + $0x148] sm:$0xff] }
 0x657   :  { %v535_v31 = vmul.f32 %v534_v30, %v534_v30  ;;  %v799_v22 = vsub.f32 %v790_v12, %v798_v21  ;;  %v829_v12 = vld [vmem:[%s1825_s1 + $0x130] sm:$0xff] }
 0x658   :  { %v1408_v15 = vpack.c.bf16 %v829_v12, %v828_v11 }
 0x659   :  { %v536_v32 = vsel %vm146_vm2, %v535_v31, 0.0  ;;  %v800_v23 = vmul.f32 %v799_v22, %v799_v22 }
 0x65a   :  { %v537_v33 = vrot.slane %v536_v32, 4 }
 0x65b   :  { %v801_v24 = vsel %vm33_vm1, %v800_v23, 0.0  ;;  %v943_v23 = vld [vmem:[%s1825_s1 + $0x160] sm:$0xff] }
 0x65c   :  { %v538_v36 = vadd.f32 %v537_v33, %v536_v32  ;;  %v802_v25 = vrot.slane %v801_v24, 4 }
 0x65e   :  { %v539_v37 = vrot.slane %v538_v36, 2  ;;  %v803_v29 = vadd.f32 %v802_v25, %v801_v24  ;;  %v945_v25 = vld [vmem:[%s1825_s1 + $0x170] sm:$0xff] }
 0x660   :  { %v540_v38 = vadd.f32 %v539_v37, %v538_v36  ;;  %v804_v31 = vrot.slane %v803_v29, 2 }
 0x662   :  { %v541_v39 = vrot.slane %v540_v38, 1  ;;  %v805_v36 = vadd.f32 %v804_v31, %v803_v29 }
 0x664   :  { %v542_v40 = vadd.f32 %v541_v39, %v540_v38  ;;  %v806_v39 = vrot.slane %v805_v36, 1 }
 0x666   :  { %v543_v41 = vmul.f32 0.125, %v542_v40 }
 0x668   :  { %v545_v42 = vadd.f32 1e-05, %v543_v41 }
 0x66a   :  { %1453 = vrsqrt.f32 %v545_v42  ;;  %v807_v42 = vadd.f32 %v806_v39, %v805_v36 }
 0x674   :  { %v1454_v44 = vpop.eup %1453 }
 0x675   :  { %v547_v45 = vmul.f32 %v1454_v44, %v544_v43 }
 0x677   :  { %v551_v46 = vrot.slane %v547_v45, %v1518_v13  ;;  %v808_v45 = vmul.f32 0.125, %v807_v42 }
 0x679   :  { %v552_v48 = vmul.f32 %v551_v46, %v534_v30 }
 0x67b   :  { %v558_v49 = vadd.f32 %v1164_v47, %v552_v48  ;;  %v810_v48 = vadd.f32 1e-05, %v808_v45 }
 0x67d   :  { %v559_v50 = vmul.f32 0.2, %v558_v49  ;;  %1455 = vrsqrt.f32 %v810_v48 }
 0x67f   :  { %v560_v51 = vmax.f32 %v558_v49, %v559_v50 }
 0x681   :  { %1302 = vmatmul.mubr.msk.f32.vlgmr.msra.gmra.mrb[2].mxu1 %vm146_vm2, %v560_v51 }
 0x682   :  { %1342 = vmatprep.mubr.msk.f32.mxu1 %vm1466_vm0, %v1467_v10  ;;  %1412 = vmatpush3.bf16.msra.mxu1 %v1411_v20 }
 0x683   :  { %1413 = vmatprep.subr.bf16.mxu1 %v1465_v6 }
 0x687   :  { %v1456_v53 = vpop.eup %1455 }
 0x688   :  { %v812_v56 = vmul.f32 %v1456_v53, %v809_v54  ;;  %v1171_v54 = vld [vmem:[%s1825_s1 + $0x1a9] ss:$0 sm:$0xff] }
 0x68a   :  { %v816_v59 = vrot.slane %v812_v56, %v1518_v13 }
 0x68c   :  { %v817_v63 = vmul.f32 %v816_v59, %v799_v22  ;;  %v942_v22 = vld [vmem:[%s1825_s1 + $0x158] sm:$0xff] }
 0x68d   :  { %v1417_v24 = vpack.c.bf16 %v943_v23, %v942_v22  ;;  %v1054_v59 = vld [vmem:[%s1825_s1 + $0x178] sm:$0xff] }
 0x68e   :  { %v823_v8 = vadd.f32 %v1169_v4, %v817_v63  ;;  %v1057_v63 = vld [vmem:[%s1825_s1 + $0x190] sm:$0xff] }
 0x690   :  { %v824_v16 = vmul.f32 0.2, %v823_v8 }
 0x692   :  { %v825_v17 = vmax.f32 %v823_v8, %v824_v16 }
 0x754   :  { %v638_v34 = vpop.f32.mrb[2].mxu1 }
 0x755   :  { %v642_v35 = vsel %vm33_vm1, %v638_v34, 0.0  ;;  %v1303_v26 = vpop.f32.mrb[3].mxu1 }
 0x756   :  { %v643_v27 = vrot.slane %v642_v35, 4 }
 0x758   :  { %v644_v28 = vadd.f32 %v643_v27, %v642_v35 }
 0x75a   :  { %v645_v1 = vrot.slane %v644_v28, 2 }
 0x75c   :  { %v646_v30 = vadd.f32 %v645_v1, %v644_v28 }
 0x75e   :  { %v647_v32 = vrot.slane %v646_v30, 1 }
 0x760   :  { %v648_v33 = vadd.f32 %v647_v32, %v646_v30 }
 0x762   :  { %v649_v37 = vmul.f32 0.125, %v648_v33 }
 0x764   :  { %v650_v38 = vsub.f32 %v638_v34, %v649_v37  ;;  %v944_v34 = vld [vmem:[%s1825_s1 + $0x168] sm:$0xff] }
 0x765   :  { %v1420_v35 = vpack.c.bf16 %v945_v25, %v944_v34 }
 0x766   :  { %v651_v40 = vmul.f32 %v650_v38, %v650_v38 }
 0x768   :  { %v652_v41 = vsel %vm33_vm1, %v651_v40, 0.0 }
 0x769   :  { %v653_v43 = vrot.slane %v652_v41, 4 }
 0x76b   :  { %v654_v44 = vadd.f32 %v653_v43, %v652_v41 }
 0x76d   :  { %v655_v46 = vrot.slane %v654_v44, 2 }
 0x76f   :  { %v656_v47 = vadd.f32 %v655_v46, %v654_v44 }
 0x771   :  { %v657_v49 = vrot.slane %v656_v47, 1 }
 0x773   :  { %v658_v50 = vadd.f32 %v657_v49, %v656_v47 }
 0x775   :  { %v659_v51 = vmul.f32 0.125, %v658_v50  ;;  %v921_v50 = vld [vmem:[%s1825_s1 + $0x1a8] sm:$0x1] }
 0x777   :  { %v661_v52 = vadd.f32 1e-05, %v659_v51 }
 0x779   :  { %1457 = vrsqrt.f32 %v661_v52 }
 0x783   :  { %v1458_v57 = vpop.eup %1457 }
 0x784   :  { %v663_v58 = vmul.f32 %v1458_v57, %v660_v55 }
 0x786   :  { %v667_v60 = vrot.slane %v663_v58, %v1518_v13 }
 0x788   :  { %v668_v62 = vmul.f32 %v667_v60, %v650_v38  ;;  %v1055_v60 = vld [vmem:[%s1825_s1 + $0x180] sm:$0xff] }
 0x78a   :  { %v674_v0 = vadd.f32 %v1166_v61, %v668_v62  ;;  %v1423_v61 = vpack.c.bf16 %v1055_v60, %v1054_v59  ;;  %v1056_v62 = vld [vmem:[%s1825_s1 + $0x188] sm:$0xff] }
 0x78c   :  { %v675_v5 = vmul.f32 0.2, %v674_v0 }
 0x78e   :  { %v676_v9 = vmax.f32 %v674_v0, %v675_v5  ;;  %v1426_v0 = vpack.c.bf16 %v1057_v63, %v1056_v62 }
 0x790   :  { %1313 = vmatmul.mubr.msk.f32.vlgmr.msra.gmra.mrb[6].mxu0 %vm33_vm1, %v676_v9 }
 0x791   :  { %1406 = vmatpush3.bf16.msra.mxu0 %v1405_v7  ;;  %1323 = vmatprep.mubr.msk.f32.mxu0 %vm1466_vm0, %v1467_v10 }
 0x792   :  { %1407 = vmatprep.subr.bf16.mxu0 %v1465_v6 }
 0x795   :  { %1409 = vmatpush3.bf16.msra.mxu0 %v1408_v15 }
 0x796   :  { %1422 = vmatprep.subr.bf16.mxu0 %v1465_v6 }
 0x798   :  { %1324 = vmatmul.mubr.msk.f32.vlgmr.msra.gmra.mrb[8].mxu0 %vm33_vm1, %v825_v17 }
 0x799   :  { %1353 = vmatprep.mubr.msk.f32.mxu0 %vm1466_vm0, %v1467_v10  ;;  %v941_v10 = vld [vmem:[%s1825_s1 + $0x150] sm:$0xff]  ;;  %1424 = vmatpush3.bf16.msra.mxu0 %v1423_v61 }
 0x79a   :  { %v1414_v21 = vpack.c.bf16 %v941_v10, %v940_v14  ;;  %1425 = vmatprep.subr.bf16.mxu0 %v1465_v6 }
 0x79c   :  { %1415 = vmatpush3.bf16.msra.mxu1 %v1414_v21 }
 0x79d   :  { %1416 = vmatprep.subr.bf16.mxu1 %v1465_v6  ;;  %1427 = vmatpush3.bf16.msra.mxu0 %v1426_v0 }
 0x7a0   :  { %1418 = vmatpush3.bf16.msra.mxu1 %v1417_v24  ;;  %v1037_v24 = vld [vmem:[%s1825_s1 + $0x1aa] sm:$0x1] }
 0x7a1   :  { %1419 = vmatprep.subr.bf16.mxu1 %v1465_v6 }
 0x7a4   :  { %1421 = vmatpush3.bf16.msra.mxu1 %v1420_v35 }
 0x863   :  { %v1778_v26 = vpop.f32.mrb[6].mxu0 }
 0x864   :  { %v1314_v27 = vpop.f32.mrb[7].mxu0 }
 0x865   :  { %v1173_v27 = vld [vmem:[%s1825_s1 + $0x1ab] ss:$0 sm:$0xff] }
 0x86b   :  { %v899_v28 = vpop.f32.mrb[8].mxu0 }
 0x86c   :  { %v903_v29 = vsel %vm146_vm2, %v899_v28, 0.0  ;;  %v1325_v1 = vpop.f32.mrb[9].mxu0 }
 0x86d   :  { %v904_v30 = vrot.slane %v903_v29, 4 }
 0x86f   :  { %v905_v31 = vadd.f32 %v904_v30, %v903_v29 }
 0x871   :  { %v906_v32 = vrot.slane %v905_v31, 2 }
 0x873   :  { %v907_v33 = vadd.f32 %v906_v32, %v905_v31  ;;  %v1174_v31 = vld [vmem:[%s1825_s1 + $0x1ac] ss:$0 sm:$0xff] }
 0x875   :  { %v908_v36 = vrot.slane %v907_v33, 1 }
 0x877   :  { %v909_v37 = vadd.f32 %v908_v36, %v907_v33 }
 0x879   :  { %v910_v38 = vmul.f32 0.125, %v909_v37 }
 0x87b   :  { %v911_v39 = vsub.f32 %v899_v28, %v910_v38 }
 0x87d   :  { %v912_v40 = vmul.f32 %v911_v39, %v911_v39 }
 0x87f   :  { %v913_v41 = vsel %vm146_vm2, %v912_v40, 0.0 }
 0x880   :  { %v914_v42 = vrot.slane %v913_v41, 4 }
 0x882   :  { %v915_v43 = vadd.f32 %v914_v42, %v913_v41 }
 0x884   :  { %v916_v44 = vrot.slane %v915_v43, 2 }
 0x886   :  { %v917_v45 = vadd.f32 %v916_v44, %v915_v43 }
 0x888   :  { %v918_v46 = vrot.slane %v917_v45, 1 }
 0x88a   :  { %v919_v47 = vadd.f32 %v918_v46, %v917_v45 }
 0x88c   :  { %v920_v48 = vmul.f32 0.125, %v919_v47 }
 0x88e   :  { %v922_v49 = vadd.f32 1e-05, %v920_v48 }
 0x890   :  { %1459 = vrsqrt.f32 %v922_v49 }
 0x89a   :  { %v1460_v51 = vpop.eup %1459 }
 0x89b   :  { %v924_v52 = vmul.f32 %v1460_v51, %v921_v50 }
 0x89d   :  { %v928_v53 = vrot.slane %v924_v52, %v1518_v13 }
 0x89f   :  { %v929_v55 = vmul.f32 %v928_v53, %v911_v39  ;;  %v1141_v39 = vpop.permute.xlu1 %1140 }
 0x8a1   :  { %v935_v56 = vadd.f32 %v1171_v54, %v929_v55 }
 0x8a3   :  { %v936_v57 = vmul.f32 0.2, %v935_v56 }
 0x8a5   :  { %v937_v58 = vmax.f32 %v935_v56, %v936_v57 }
 0x8a7   :  { %1343 = vmatmul.mubr.msk.f32.vlgmr.msra.gmra.mrb[4].mxu1 %vm146_vm2, %v937_v58 }
 0x97a   :  { %v1015_v2 = vpop.f32.mrb[4].mxu1 }
 0x97b   :  { %v1019_v3 = vsel %vm33_vm1, %v1015_v2, 0.0  ;;  %v1344_v4 = vpop.f32.mrb[5].mxu1 }
 0x97c   :  { %v1020_v5 = vrot.slane %v1019_v3, 4 }
 0x97e   :  { %v1021_v7 = vadd.f32 %v1020_v5, %v1019_v3 }
 0x980   :  { %v1022_v8 = vrot.slane %v1021_v7, 2 }
 0x982   :  { %v1023_v9 = vadd.f32 %v1022_v8, %v1021_v7 }
 0x984   :  { %v1024_v11 = vrot.slane %v1023_v9, 1 }
 0x986   :  { %v1025_v6 = vadd.f32 %v1024_v11, %v1023_v9 }
 0x988   :  { %v1026_v12 = vmul.f32 0.125, %v1025_v6 }
 0x98a   :  { %v1027_v15 = vsub.f32 %v1015_v2, %v1026_v12 }
 0x98c   :  { %v1028_v16 = vmul.f32 %v1027_v15, %v1027_v15 }
 0x98e   :  { %v1029_v17 = vsel %vm33_vm1, %v1028_v16, 0.0 }
 0x98f   :  { %v1030_v18 = vrot.slane %v1029_v17, 4 }
 0x991   :  { %v1031_v19 = vadd.f32 %v1030_v18, %v1029_v17 }
 0x993   :  { %v1032_v20 = vrot.slane %v1031_v19, 2 }
 0x995   :  { %v1033_v14 = vadd.f32 %v1032_v20, %v1031_v19 }
 0x997   :  { %v1034_v10 = vrot.slane %v1033_v14, 1 }
 0x999   :  { %v1035_v21 = vadd.f32 %v1034_v10, %v1033_v14 }
 0x99b   :  { %v1036_v22 = vmul.f32 0.125, %v1035_v21 }
 0x99d   :  { %v1038_v23 = vadd.f32 1e-05, %v1036_v22 }
 0x99f   :  { %1461 = vrsqrt.f32 %v1038_v23 }
 0x9a9   :  { %v1462_v34 = vpop.eup %1461 }
 0x9aa   :  { %v1040_v25 = vmul.f32 %v1462_v34, %v1037_v24 }
 0x9ac   :  { %v1044_v35 = vrot.slane %v1040_v25, %v1518_v13  ;;  %v1167_v13 = vld [vmem:[%s1825_s1 + $0x1a5] ss:$0 sm:$0xff] }
 0x9ad   :  { %v756_v37 = vadd.f32 %v1167_v13, %v1778_v26 }
 0x9ae   :  { %v1045_v28 = vmul.f32 %v1044_v35, %v1027_v15 }
 0x9b0   :  { %v1051_v29 = vadd.f32 %v1173_v27, %v1045_v28 }
 0x9b2   :  { %v1052_v1 = vmul.f32 0.2, %v1051_v29 }
 0x9b4   :  { %v1053_v30 = vmax.f32 %v1051_v29, %v1052_v1 }
 0x9b6   :  { %1354 = vmatmul.mubr.msk.f32.vlgmr.msra.gmra.mrb[10].mxu0 %vm33_vm1, %v1053_v30 }
 0xa89   :  { %v1132_v32 = vpop.f32.mrb[10].mxu0 }
 0xa8a   :  { %v1133_v33 = vadd.f32 %v1174_v31, %v1132_v32  ;;  %v1355_v36 = vpop.f32.mrb[11].mxu0 }
 0xa8c   :  { %1137 = vrot.lane.b32.xlu0 %v1133_v33, %s1468_s29 }
 0xafe   :  { %v1138_v38 = vpop.permute.xlu0 %1137 }
 0xaff   :  { %v1144_v40 = vsel %vm1143_vm3, %v756_v37, %v1138_v38 }
 0xb00   :  { %v1146_v41 = vsel %vm1145_vm4, %v1144_v40, %v1141_v39 }
 0xb01   :  { %v1148_v42 = vsel %vm1147_vm5, %v1146_v41, 0.0 }
 0xb02   :  { %1150 = vst.msk [vmem:[%s1826_s2] sm:$0xff] %vm1149_vm6, %v1148_v42 }

</bundles_post_ra>
